<compile_context>
chip_gen: v7x
topology: tpu7x:2x2x1
jax: 0.10.0
libtpu: 0.0.40
codegen_flags: <defaults>
</compile_context>

<pallas_src>
import math
import jax
import jax.numpy as jnp
from jax.experimental import pallas as pl
from jax.experimental.pallas import tpu as pltpu

_GELU_C = math.sqrt(2.0 / math.pi)


def _round_up(x, m):
    return ((x + m - 1) // m) * m


def _vmem_budget_bytes():
    """80% of physical VMEM (falls back to a v7x-safe 64 MiB if unqueryable)."""
    cap = 64 * 1024 * 1024
    try:
        info = pltpu.get_tpu_info()
        c = getattr(info, "vmem_capacity_bytes", None)
        if c:
            cap = int(c)
    except Exception:
        pass
    return int(cap * 0.8)


def _make_mlp_kernel(tk, resident):
    """Kernel factory. `resident`: weights are full arrays in VMEM, slice by k."""

    def kernel(x_ref, wfc_ref, bfc_ref, wproj_ref, bproj_ref, o_ref, acc_ref):
        # x_ref:     (tm, E)  input dtype     acc_ref: (tm, E) f32 scratch
        # resident:  wfc (E, H), bfc (1, H), wproj (H, E)
        # streaming: wfc (E, tk), bfc (1, tk), wproj (tk, E)
        # bproj_ref: (1, E)                    o_ref:  (tm, E) out dtype
        k = pl.program_id(1)

        @pl.when(k == 0)
        def _init():
            acc_ref[...] = jnp.zeros_like(acc_ref)

        # Cast the activation block to bf16 in-kernel (x stays f32 in HBM).
        xk = x_ref[...].astype(wfc_ref.dtype)

        if resident:
            off = pl.multiple_of(k * tk, tk)
            wfc = wfc_ref[:, pl.ds(off, tk)]
            bfc = bfc_ref[:, pl.ds(off, tk)]
            wpr = wproj_ref[pl.ds(off, tk), :]
        else:
            wfc = wfc_ref[...]
            bfc = bfc_ref[...]
            wpr = wproj_ref[...]

        # c_fc chunk: bf16 x bf16 -> f32 on the MXU, then this chunk's bias.
        h = jnp.dot(xk, wfc, preferred_element_type=jnp.float32)
        h = h + bfc.astype(jnp.float32)

        # myGelu: 0.5*h*(1 + tanh(sqrt(2/pi)*(h + 0.044715*h^3)))
        # inner polynomial as h*(1 + 0.044715*h*h)  (one fewer VALU mul).
        g = 0.5 * h * (1.0 + jnp.tanh(_GELU_C * (h * (1.0 + 0.044715 * (h * h)))))

        # c_proj chunk: bf16 operands to the MXU, f32 accumulation.
        acc_ref[...] += jnp.dot(g.astype(wpr.dtype), wpr,
                                preferred_element_type=jnp.float32)

        @pl.when(k == pl.num_programs(1) - 1)
        def _finalize():
            # b_proj added exactly once; dropout(p=0) is identity.
            y = acc_ref[...] + bproj_ref[...].astype(jnp.float32)
            o_ref[...] = y.astype(o_ref.dtype)

    return kernel


def mlp_forward(x, w_fc, b_fc, w_proj, b_proj, *, tm=512, tk=1024,
                param_dtype=jnp.bfloat16, out_dtype=None):
    """x: (B, T, n_embd); weights stored (in, out) i.e. PyTorch weight.T.

    Returns (B, T, n_embd) in `out_dtype` (default: x.dtype).
    """
    B, T, n_embd = x.shape
    hidden = w_fc.shape[1]
    M = B * T
    E, H = n_embd, hidden
    out_dtype = x.dtype if out_dtype is None else jnp.dtype(out_dtype)

    x_bytes = jnp.dtype(x.dtype).itemsize
    out_bytes = jnp.dtype(out_dtype).itemsize
    p_bytes = jnp.dtype(param_dtype).itemsize

    # ---- hidden-dim tile: multiple of 128 that divides hidden --------------
    tk_eff = min(tk, hidden)
    if hidden % 128 == 0:
        tk_eff = (tk_eff // 128) * 128
        while tk_eff >= 128 and hidden % tk_eff != 0:
            tk_eff -= 128
        if tk_eff < 128:
            tk_eff = hidden
    else:
        tk_eff = hidden  # odd hidden: single full chunk

    # ---- row tile: multiple of 16 (bf16 sublanes); >=2 tiles when possible --
    tm_eff = max(16, min(tm, _round_up(M, 16)))
    if tm_eff >= M and M >= 32:
        # split rows into two tiles so both v7x TensorCores get work
        tm_eff = _round_up((M + 1) // 2, 16)

    # ---- VMEM budgeting (conservative: everything double-buffered) ---------
    def _footprint(tm_e, tk_e, resident):
        w_full = 2 * E * H * p_bytes                       # W_fc + W_proj
        wbuf = 2 * w_full if resident else 4 * E * tk_e * p_bytes
        bias = 2 * 2 * (H + E) * p_bytes
        return (2 * tm_e * E * x_bytes       # x blocks
                + 2 * tm_e * E * out_bytes   # out blocks
                + tm_e * E * 4               # f32 accumulator scratch
                + wbuf + bias)

    budget = _vmem_budget_bytes()
    resident = _footprint(tm_eff, tk_eff, True) <= budget
    if not resident:
        while (_footprint(tm_eff, tk_eff, False) > budget
               and tk_eff > 128 and tk_eff % 256 == 0):
            tk_eff //= 2
        while _footprint(tm_eff, tk_eff, False) > budget and tm_eff > 16:
            tm_eff = max(16, _round_up(tm_eff // 2, 16))

    M_pad = _round_up(M, tm_eff)
    grid = (M_pad // tm_eff, hidden // tk_eff)

    # ---- operands: weights one-time cast to bf16; x fed as-is (no astype) --
    x2 = x.reshape(M, n_embd)
    if M_pad != M:
        x2 = jnp.pad(x2, ((0, M_pad - M), (0, 0)))
    wfc = w_fc.astype(param_dtype)
    bfc = b_fc.reshape(1, hidden).astype(param_dtype)
    wpr = w_proj.astype(param_dtype)
    bpr = b_proj.reshape(1, n_embd).astype(param_dtype)

    if resident:
        wfc_spec = pl.BlockSpec((n_embd, hidden), lambda i, k: (0, 0))
        bfc_spec = pl.BlockSpec((1, hidden), lambda i, k: (0, 0))
        wpr_spec = pl.BlockSpec((hidden, n_embd), lambda i, k: (0, 0))
    else:
        wfc_spec = pl.BlockSpec((n_embd, tk_eff), lambda i, k: (0, k))
        bfc_spec = pl.BlockSpec((1, tk_eff), lambda i, k: (0, k))
        wpr_spec = pl.BlockSpec((tk_eff, n_embd), lambda i, k: (k, 0))

    out = pl.pallas_call(
        _make_mlp_kernel(tk_eff, resident),
        out_shape=jax.ShapeDtypeStruct((M_pad, n_embd), out_dtype),
        grid_spec=pltpu.PrefetchScalarGridSpec(
            num_scalar_prefetch=0,
            grid=grid,
            in_specs=[
                pl.BlockSpec((tm_eff, n_embd), lambda i, k: (i, 0)),   # x rows
                wfc_spec,                                              # W_fc
                bfc_spec,                                              # b_fc
                wpr_spec,                                              # W_proj
                pl.BlockSpec((1, n_embd), lambda i, k: (0, 0)),        # b_proj
            ],
            out_specs=pl.BlockSpec((tm_eff, n_embd), lambda i, k: (i, 0)),
            scratch_shapes=[pltpu.VMEM((tm_eff, n_embd), jnp.float32)],
        ),
        compiler_params=pltpu.CompilerParams(
            dimension_semantics=("parallel", "arbitrary"),
            vmem_limit_bytes=budget),
    )(x2, wfc, bfc, wpr, bpr)

    return out[:M].reshape(B, T, n_embd)


def _reference_mlp(x, w_fc, b_fc, w_proj, b_proj, param_dtype=jnp.bfloat16):
    """bf16-operand reference matching the kernel's numerics, math in f32."""
    f32 = jnp.float32
    xb = x.astype(param_dtype).astype(f32)
    wfc = w_fc.astype(param_dtype).astype(f32)
    bfc = b_fc.astype(param_dtype).astype(f32).reshape(1, -1)
    wpr = w_proj.astype(param_dtype).astype(f32)
    bpr = b_proj.astype(param_dtype).astype(f32).reshape(1, -1)

    h = xb @ wfc + bfc
    g = 0.5 * h * (1.0 + jnp.tanh(_GELU_C * (h + 0.044715 * h ** 3)))
    y = g.astype(param_dtype).astype(f32) @ wpr + bpr
    return y.astype(x.dtype)


if __name__ == "__main__":
    # config: n_embd=128, bias=True, dropout=0.0 ; batch=2, seq=8
    B, T, n_embd = 2, 8, 128
    hidden = 4 * n_embd

    key = jax.random.PRNGKey(0)
    kx, k1, k2, k3, k4 = jax.random.split(key, 5)

    x = jax.random.normal(kx, (B, T, n_embd), dtype=jnp.float32)

    # nn.Linear-style init: U(-1/sqrt(fan_in), 1/sqrt(fan_in)); stored (in, out).
    bound_fc = 1.0 / math.sqrt(n_embd)
    w_fc = jax.random.uniform(k1, (n_embd, hidden), jnp.float32, -bound_fc, bound_fc)
    b_fc = jax.random.uniform(k2, (hidden,), jnp.float32, -bound_fc, bound_fc)

    bound_pr = 1.0 / math.sqrt(hidden)
    w_proj = jax.random.uniform(k3, (hidden, n_embd), jnp.float32, -bound_pr, bound_pr)
    b_proj = jax.random.uniform(k4, (n_embd,), jnp.float32, -bound_pr, bound_pr)

    y = mlp_forward(x, w_fc, b_fc, w_proj, b_proj)
    jax.block_until_ready(y)

    y_ref = _reference_mlp(x.reshape(-1, n_embd), w_fc, b_fc, w_proj,
                           b_proj).reshape(B, T, n_embd)
    assert y.shape == (B, T, n_embd)
    # bf16 MXU operands -> bf16-appropriate tolerances vs the bf16 reference.
    assert jnp.allclose(y, y_ref, atol=2e-2, rtol=2e-2), (
        float(jnp.max(jnp.abs(y - y_ref))))

    print("KERNEL_OK")
</pallas_src>

<mosaic_0001>
module attributes {stable_mosaic.version = 11 : i64} {
  func.func @kernel(%arg0: i32, %arg1: i32, %arg2: memref<16x128xf32, #tpu.memory_space<vmem>>, %arg3: memref<128x512xbf16, #tpu.memory_space<vmem>>, %arg4: memref<1x512xbf16, #tpu.memory_space<vmem>>, %arg5: memref<512x128xbf16, #tpu.memory_space<vmem>>, %arg6: memref<1x128xbf16, #tpu.memory_space<vmem>>, %arg7: memref<16x128xf32, #tpu.memory_space<vmem>>, %arg8: memref<16x128xf32, #tpu.memory_space<vmem>>) attributes {dimension_semantics = [#tpu.dimension_semantics<parallel>, #tpu.dimension_semantics<arbitrary>], iteration_bounds = array<i64: 1, 1>, scalar_prefetch = 0 : i64, scratch_operands = 1 : i64, tpu.core_type = #tpu.core_type<tc>, window_params = [{transform_indices = @transform_0, window_bounds = array<i64: 16, 128>}, {pipeline_mode = #tpu.pipeline_mode<synchronous>, transform_indices = @transform_1, window_bounds = array<i64: 128, 512>}, {pipeline_mode = #tpu.pipeline_mode<synchronous>, transform_indices = @transform_2, window_bounds = array<i64: 1, 512>}, {pipeline_mode = #tpu.pipeline_mode<synchronous>, transform_indices = @transform_3, window_bounds = array<i64: 512, 128>}, {pipeline_mode = #tpu.pipeline_mode<synchronous>, transform_indices = @transform_4, window_bounds = array<i64: 1, 128>}, {transform_indices = @transform_5, window_bounds = array<i64: 16, 128>}]} {
    %c0_i32 = arith.constant 0 : i32
    %0 = arith.cmpi eq, %arg1, %c0_i32 : i32
    %1 = arith.extui %0 : i1 to i32
    %c0_i32_0 = arith.constant 0 : i32
    %2 = arith.cmpi ne, %1, %c0_i32_0 : i32
    scf.if %2 {
      %cst_17 = arith.constant 0.000000e+00 : f32
      %39 = vector.broadcast %cst_17 : f32 to vector<16x128xf32>
      %c0_18 = arith.constant 0 : index
      %c0_19 = arith.constant 0 : index
      %40 = vector.load %arg8[%c0_18, %c0_19] : memref<16x128xf32, #tpu.memory_space<vmem>>, vector<16x128xf32>
      tpu.vector_store %arg8[%c0_18, %c0_19], %39 {strides = array<i32>} : memref<16x128xf32, #tpu.memory_space<vmem>>, vector<16x128xf32>,
    } else {
    }
    %c0 = arith.constant 0 : index
    %c0_1 = arith.constant 0 : index
    %3 = vector.load %arg2[%c0, %c0_1] : memref<16x128xf32, #tpu.memory_space<vmem>>, vector<16x128xf32>
    %4 = arith.truncf %3 : vector<16x128xf32> to vector<16x128xbf16>
    %c512_i32 = arith.constant 512 : i32
    %5 = arith.muli %arg1, %c512_i32 : i32
    %6 = tpu.assume_multiple %5, 512 : i32
    %c0_2 = arith.constant 0 : index
    %7 = arith.index_cast %6 : i32 to index
    %8 = vector.load %arg3[%c0_2, %7] : memref<128x512xbf16, #tpu.memory_space<vmem>>, vector<128x512xbf16>
    %c0_3 = arith.constant 0 : index
    %9 = arith.index_cast %6 : i32 to index
    %10 = vector.load %arg4[%c0_3, %9] : memref<1x512xbf16, #tpu.memory_space<vmem>>, vector<1x512xbf16>
    %11 = arith.index_cast %6 : i32 to index
    %c0_4 = arith.constant 0 : index
    %12 = vector.load %arg5[%11, %c0_4] : memref<512x128xbf16, #tpu.memory_space<vmem>>, vector<512x128xbf16>
    %cst = arith.constant dense<0.000000e+00> : vector<16x512xf32>
    %13 = tpu.matmul %4, %8, %cst {dimension_numbers = #tpu.dot_dimension_numbers<[1], [0], [0], [1], [0, 0, 1, 1], [], []>} : vector<16x128xbf16>, vector<128x512xbf16>, vector<16x512xf32> -> vector<16x512xf32>
    %14 = arith.extf %10 : vector<1x512xbf16> to vector<1x512xf32>
    %15 = vector.broadcast %14 : vector<1x512xf32> to vector<16x512xf32>
    %16 = arith.addf %13, %15 : vector<16x512xf32>
    %cst_5 = arith.constant 5.000000e-01 : f32
    %17 = vector.broadcast %cst_5 : f32 to vector<16x512xf32>
    %18 = arith.mulf %17, %16 : vector<16x512xf32>
    %19 = arith.mulf %16, %16 : vector<16x512xf32>
    %cst_6 = arith.constant 4.471500e-02 : f32
    %20 = vector.broadcast %cst_6 : f32 to vector<16x512xf32>
    %21 = arith.mulf %20, %19 : vector<16x512xf32>
    %cst_7 = arith.constant 1.000000e+00 : f32
    %22 = vector.broadcast %cst_7 : f32 to vector<16x512xf32>
    %23 = arith.addf %22, %21 : vector<16x512xf32>
    %24 = arith.mulf %16, %23 : vector<16x512xf32>
    %cst_8 = arith.constant 0.797884583 : f32
    %25 = vector.broadcast %cst_8 : f32 to vector<16x512xf32>
    %26 = arith.mulf %25, %24 : vector<16x512xf32>
    %27 = math.tanh %26 : vector<16x512xf32>
    %cst_9 = arith.constant 1.000000e+00 : f32
    %28 = vector.broadcast %cst_9 : f32 to vector<16x512xf32>
    %29 = arith.addf %28, %27 : vector<16x512xf32>
    %30 = arith.mulf %18, %29 : vector<16x512xf32>
    %c0_10 = arith.constant 0 : index
    %c0_11 = arith.constant 0 : index
    %31 = vector.load %arg8[%c0_10, %c0_11] : memref<16x128xf32, #tpu.memory_space<vmem>>, vector<16x128xf32>
    %32 = arith.truncf %30 : vector<16x512xf32> to vector<16x512xbf16>
    %cst_12 = arith.constant dense<0.000000e+00> : vector<16x128xf32>
    %33 = tpu.matmul %32, %12, %cst_12 {dimension_numbers = #tpu.dot_dimension_numbers<[1], [0], [0], [1], [0, 0, 1, 1], [], []>} : vector<16x512xbf16>, vector<512x128xbf16>, vector<16x128xf32> -> vector<16x128xf32>
    %34 = arith.addf %31, %33 : vector<16x128xf32>
    %c0_13 = arith.constant 0 : index
    %c0_14 = arith.constant 0 : index
    %35 = vector.load %arg8[%c0_13, %c0_14] : memref<16x128xf32, #tpu.memory_space<vmem>>, vector<16x128xf32>
    tpu.vector_store %arg8[%c0_13, %c0_14], %34 {strides = array<i32>} : memref<16x128xf32, #tpu.memory_space<vmem>>, vector<16x128xf32>,
    %c0_i32_15 = arith.constant 0 : i32
    %36 = arith.cmpi eq, %arg1, %c0_i32_15 : i32
    %37 = arith.extui %36 : i1 to i32
    %c0_i32_16 = arith.constant 0 : i32
    %38 = arith.cmpi ne, %37, %c0_i32_16 : i32
    scf.if %38 {
      %c0_17 = arith.constant 0 : index
      %c0_18 = arith.constant 0 : index
      %39 = vector.load %arg8[%c0_17, %c0_18] : memref<16x128xf32, #tpu.memory_space<vmem>>, vector<16x128xf32>
      %c0_19 = arith.constant 0 : index
      %c0_20 = arith.constant 0 : index
      %40 = vector.load %arg6[%c0_19, %c0_20] : memref<1x128xbf16, #tpu.memory_space<vmem>>, vector<1x128xbf16>
      %41 = arith.extf %40 : vector<1x128xbf16> to vector<1x128xf32>
      %42 = vector.broadcast %41 : vector<1x128xf32> to vector<16x128xf32>
      %43 = arith.addf %39, %42 : vector<16x128xf32>
      %c0_21 = arith.constant 0 : index
      %c0_22 = arith.constant 0 : index
      %44 = vector.load %arg7[%c0_21, %c0_22] : memref<16x128xf32, #tpu.memory_space<vmem>>, vector<16x128xf32>
      tpu.vector_store %arg7[%c0_21, %c0_22], %43 {strides = array<i32>} : memref<16x128xf32, #tpu.memory_space<vmem>>, vector<16x128xf32>,
    } else {
    }
    return
  }
  func.func @transform_0(%arg0: i32, %arg1: i32) -> (i32, i32) {
    %c0_i32 = arith.constant 0 : i32
    %c0_i32_0 = arith.constant 0 : i32
    return %arg0, %c0_i32 : i32, i32
  }
  func.func @transform_1(%arg0: i32, %arg1: i32) -> (i32, i32) {
    %c0_i32 = arith.constant 0 : i32
    %c0_i32_0 = arith.constant 0 : i32
    %c0_i32_1 = arith.constant 0 : i32
    return %c0_i32, %c0_i32_0 : i32, i32
  }
  func.func @transform_2(%arg0: i32, %arg1: i32) -> (i32, i32) {
    %c0_i32 = arith.constant 0 : i32
    %c0_i32_0 = arith.constant 0 : i32
    %c0_i32_1 = arith.constant 0 : i32
    return %c0_i32, %c0_i32_0 : i32, i32
  }
  func.func @transform_3(%arg0: i32, %arg1: i32) -> (i32, i32) {
    %c0_i32 = arith.constant 0 : i32
    %c0_i32_0 = arith.constant 0 : i32
    %c0_i32_1 = arith.constant 0 : i32
    return %c0_i32, %c0_i32_0 : i32, i32
  }
  func.func @transform_4(%arg0: i32, %arg1: i32) -> (i32, i32) {
    %c0_i32 = arith.constant 0 : i32
    %c0_i32_0 = arith.constant 0 : i32
    %c0_i32_1 = arith.constant 0 : i32
    return %c0_i32, %c0_i32_0 : i32, i32
  }
  func.func @transform_5(%arg0: i32, %arg1: i32) -> (i32, i32) {
    %c0_i32 = arith.constant 0 : i32
    %c0_i32_0 = arith.constant 0 : i32
    return %arg0, %c0_i32 : i32, i32
  }
}

</mosaic_0001>

<bundles_post_ra>
// kernel: tpu_custom_call.1
= control target key start
LH: loop header
LB: loop body
LE: loop exit
PB: predicated region body
PF: predicated region fallthrough
CT: control target
= control target key end

     0   :  { %10 = vsyncpa [#allocation4], 0  ;;  %s1305_s0 = inlined_call_operand.hbm [shape: f32[16,128], index: 0, kind: input, shape index: {}]   ;;  %s1306_s1 = inlined_call_operand.hbm [shape: bf16[128,512], index: 1, kind: input, shape index: {}]   ;;  %s1307_s2 = inlined_call_operand.vmem [shape: bf16[1,512], index: 2, kind: input, shape index: {}]   ;;  %s1308_s3 = inlined_call_operand.hbm [shape: bf16[512,128], index: 3, kind: input, shape index: {}]   ;;  %s1309_s4 = inlined_call_operand.vmem [shape: bf16[1,128], index: 4, kind: input, shape index: {}]   ;;  %s1310_s5 = inlined_call_operand.hbm [shape: f32[16,128], index: 5, kind: output, shape index: {}]  }
   0x1   :  { %11 = vsyncpa [#allocation7], 0 }
   0x2   :  { %12 = vsyncpa [#allocation5], 0  ;;  %s1166_s18 = smov [#allocation6]   ;;  %s1072_s22 = scalar_lea.hbm %s1306_s1, 4096 }
   0x3   :  { %s30_s19 = sshll.u32 %s1166_s18, 4  ;;  %p1073_p0 = scmp.ne.s32.totalorder %s1306_s1, %s1072_s22  ;;  %s31_s19 = int_to_ptr.vmem [resolvable:$true] %s30_s19 }
   0x4   :  { %p1076_p1 = scmp.lt.u32.totalorder %s1072_s22, %s1306_s1 }
   0x6   :  { %p1078_p2 = pnand %p1076_p1, %p1073_p0 }
   0x8   :  { %1081 = shalt.err (!%p1078_p2)
}
   0x9   :  { %s1082_s27 = scalar_lea.vmem %s31_s19, 4096  ;;  %p1087_p4 = scmp.lt.s32.totalorder %s31_s19, %s31_s19 }
   0xa   :  { %p1083_p3 = scmp.ne.s32.totalorder %s31_s19, %s1082_s27  ;;  %p1088_p5 = scmp.lt.s32.totalorder %s1082_s27, %s1082_s27 }
   0xc   :  { %p1089_p6 = por %p1088_p5, %p1087_p4 }
   0xe   :  { %p1090_p7 = pnand %p1089_p6, %p1083_p3 }
  0x10   :  { %1093 = shalt.err (!%p1090_p7)
}
  0x11   :  { %s1167_s28 = smov 256   ;;  %s1168_s29 = smov 16  }
  0x12   :  { %36 = dma.hbm_to_vmem [thread:$0]  %s1306_s1, 4096, %s31_s19, [#allocation7], %s1167_s28, %s1167_s28, %s1168_s29  }
  0x13   :  { %s1169_s7 = smov [#allocation3]   ;;  %s1094_s11 = scalar_lea.hbm %s1305_s0, 256 }
  0x14   :  { %s18_s8 = sshll.u32 %s1169_s7, 4  ;;  %p1095_p8 = scmp.ne.s32.totalorder %s1305_s0, %s1094_s11  ;;  %s19_s8 = int_to_ptr.vmem [resolvable:$true] %s18_s8 }
  0x15   :  { %p1098_p9 = scmp.lt.u32.totalorder %s1094_s11, %s1305_s0 }
  0x17   :  { %p1100_p10 = pnand %p1098_p9, %p1095_p8 }
  0x19   :  { %1103 = shalt.err (!%p1100_p10)
}
  0x1a   :  { %s1104_s16 = scalar_lea.vmem %s19_s8, 256  ;;  %p1109_p12 = scmp.lt.s32.totalorder %s19_s8, %s19_s8 }
  0x1b   :  { %p1105_p11 = scmp.ne.s32.totalorder %s19_s8, %s1104_s16  ;;  %p1110_p13 = scmp.lt.s32.totalorder %s1104_s16, %s1104_s16 }
  0x1d   :  { %p1111_p0 = por %p1110_p13, %p1109_p12 }
  0x1f   :  { %p1112_p1 = pnand %p1111_p0, %p1105_p11 }
  0x21   :  { %1115 = shalt.err (!%p1112_p1)
}
  0x22   :  { %s1170_s1 = smov 128   ;;  %s1171_s17 = smov 8  }
  0x23   :  { %24 = dma.hbm_to_vmem [thread:$0]  %s1305_s0, 256, %s19_s8, [#allocation4], %s1170_s1, %s1170_s1, %s1171_s17  }
  0x24   :  { %s1172_s20 = smov [#allocation8]   ;;  %s1116_s24 = scalar_lea.hbm %s1308_s3, 4096 }
  0x25   :  { %s44_s21 = sshll.u32 %s1172_s20, 4  ;;  %p1117_p2 = scmp.ne.s32.totalorder %s1308_s3, %s1116_s24  ;;  %s45_s21 = int_to_ptr.vmem [resolvable:$true] %s44_s21 }
  0x26   :  { %p1120_p3 = scmp.lt.u32.totalorder %s1116_s24, %s1308_s3 }
  0x28   :  { %p1122_p4 = pnand %p1120_p3, %p1117_p2 }
  0x2a   :  { %1125 = shalt.err (!%p1122_p4)
}
  0x2b   :  { %s1126_s29 = scalar_lea.vmem %s45_s21, 4096  ;;  %p1131_p6 = scmp.lt.s32.totalorder %s45_s21, %s45_s21 }
  0x2c   :  { %p1127_p5 = scmp.ne.s32.totalorder %s45_s21, %s1126_s29  ;;  %p1132_p7 = scmp.lt.s32.totalorder %s1126_s29, %s1126_s29 }
  0x2e   :  { %p1133_p8 = por %p1132_p7, %p1131_p6 }
  0x30   :  { %p1134_p9 = pnand %p1133_p8, %p1127_p5 }
  0x32   :  { %1137 = shalt.err (!%p1134_p9)
}
  0x33   :  { %s1173_s0 = smov 64   ;;  %s1174_s30 = smov 4  }
  0x34   :  { %50 = dma.hbm_to_vmem [thread:$0]  %s1308_s3, 4096, %s45_s21, [#allocation7], %s1173_s0, %s1173_s0, %s1174_s30  }
  0x35   :  { %1160 = dma.done.wait [#allocation4], 256  }
  0x36   :  { %1161 = vsyncadd [#allocation4], 4294967040 }
  0x37   :  { %1162 = dma.done.wait [#allocation7], 8192  }
  0x38   :  { %1163 = vsyncadd [#allocation7], 4294959104  ;;  %v1175_v0 = vmov 0   ;;  %v976_v1 = vld [vmem:[#allocation6 + $0x4] ss:$16 sps:$4 sm:$0xff]   ;;  %v70_v34 = vld [vmem:[#allocation3 + $0x8] sm:$0xff] }
  0x39   :  { %409 = vmatprep.mubr.bf16.mxu0 %v1175_v0  ;;  %452 = vmatprep.mubr.bf16.mxu1 %v1175_v0  ;;  %v978_v2 = vld [vmem:[#allocation6 + $0xc] ss:$16 sps:$4 sm:$0xff]   ;;  %v980_v3 = vld [vmem:[#allocation6] ss:$16 sps:$4 sm:$0xff]   ;;  %v981_v4 = vld [vmem:[#allocation6 + $0x8] ss:$16 sps:$4 sm:$0xff]  }
  0x3a   :  { %377 = vmatprep.subr.bf16.mxu0 %v976_v1  ;;  %420 = vmatprep.subr.bf16.mxu1 %v978_v2  ;;  %v982_v5 = vld [vmem:[#allocation6 + $0x24] ss:$16 sps:$4 sm:$0xff]   ;;  %v984_v6 = vld [vmem:[#allocation6 + $0x2c] ss:$16 sps:$4 sm:$0xff]   ;;  %v986_v7 = vld [vmem:[#allocation6 + $0x20] ss:$16 sps:$4 sm:$0xff]  }
  0x3b   :  { %378 = vmatpush1.bf16.msra.mxu0 %v980_v3  ;;  %421 = vmatpush1.bf16.msra.mxu1 %v981_v4  ;;  %v987_v8 = vld [vmem:[#allocation6 + $0x28] ss:$16 sps:$4 sm:$0xff]   ;;  %v988_v9 = vld [vmem:[#allocation6 + $0x44] ss:$16 sps:$4 sm:$0xff]   ;;  %v990_v10 = vld [vmem:[#allocation6 + $0x4c] ss:$16 sps:$4 sm:$0xff]   ;;  %v181_v4 = vlaneseq }
  0x3c   :  { %379 = vmatprep.subr.bf16.mxu0 %v982_v5  ;;  %422 = vmatprep.subr.bf16.mxu1 %v984_v6  ;;  %v992_v11 = vld [vmem:[#allocation6 + $0x40] ss:$16 sps:$4 sm:$0xff]   ;;  %v993_v12 = vld [vmem:[#allocation6 + $0x48] ss:$16 sps:$4 sm:$0xff]   ;;  %v994_v13 = vld [vmem:[#allocation6 + $0x64] ss:$16 sps:$4 sm:$0xff]  }
  0x3d   :  { %v996_v14 = vld [vmem:[#allocation6 + $0x6c] ss:$16 sps:$4 sm:$0xff]   ;;  %v998_v15 = vld [vmem:[#allocation6 + $0x60] ss:$16 sps:$4 sm:$0xff]   ;;  %v999_v16 = vld [vmem:[#allocation6 + $0x68] ss:$16 sps:$4 sm:$0xff]  }
  0x3e   :  { %v1000_v17 = vld [vmem:[#allocation6 + $0x84] ss:$16 sps:$4 sm:$0xff]   ;;  %v1002_v18 = vld [vmem:[#allocation6 + $0x8c] ss:$16 sps:$4 sm:$0xff]   ;;  %v1004_v19 = vld [vmem:[#allocation6 + $0x80] ss:$16 sps:$4 sm:$0xff]  }
  0x3f   :  { %380 = vmatpush1.bf16.msra.mxu0 %v986_v7  ;;  %423 = vmatpush1.bf16.msra.mxu1 %v987_v8  ;;  %v1005_v20 = vld [vmem:[#allocation6 + $0x88] ss:$16 sps:$4 sm:$0xff]   ;;  %v1006_v21 = vld [vmem:[#allocation6 + $0xa4] ss:$16 sps:$4 sm:$0xff]   ;;  %v1008_v22 = vld [vmem:[#allocation6 + $0xac] ss:$16 sps:$4 sm:$0xff]  }
  0x40   :  { %381 = vmatprep.subr.bf16.mxu0 %v988_v9  ;;  %424 = vmatprep.subr.bf16.mxu1 %v990_v10  ;;  %v1010_v23 = vld [vmem:[#allocation6 + $0xa0] ss:$16 sps:$4 sm:$0xff]   ;;  %v1011_v24 = vld [vmem:[#allocation6 + $0xa8] ss:$16 sps:$4 sm:$0xff]   ;;  %v1012_v25 = vld [vmem:[#allocation6 + $0xc4] ss:$16 sps:$4 sm:$0xff]  }
  0x41   :  { %v1014_v26 = vld [vmem:[#allocation6 + $0xcc] ss:$16 sps:$4 sm:$0xff]   ;;  %v1016_v27 = vld [vmem:[#allocation6 + $0xc0] ss:$16 sps:$4 sm:$0xff]   ;;  %v1017_v28 = vld [vmem:[#allocation6 + $0xc8] ss:$16 sps:$4 sm:$0xff]  }
  0x42   :  { %v1018_v29 = vld [vmem:[#allocation6 + $0xe4] ss:$16 sps:$4 sm:$0xff]   ;;  %v1020_v30 = vld [vmem:[#allocation6 + $0xec] ss:$16 sps:$4 sm:$0xff]   ;;  %v1022_v31 = vld [vmem:[#allocation6 + $0xe0] ss:$16 sps:$4 sm:$0xff]  }
  0x43   :  { %382 = vmatpush1.bf16.msra.mxu0 %v992_v11  ;;  %425 = vmatpush1.bf16.msra.mxu1 %v993_v12  ;;  %v1023_v32 = vld [vmem:[#allocation6 + $0xe8] ss:$16 sps:$4 sm:$0xff]   ;;  %v69_v33 = vld [vmem:[#allocation3] sm:$0xff]  ;;  %v1024_v36 = vld [vmem:[#allocation8 + $0x40] sm:$0xff]   ;;  %v182_v5 = vshrl.u32 %v181_v4, 7  ;;  %s1176_s10 = smov [#allocation9]  }
  0x44   :  { %383 = vmatprep.subr.bf16.mxu0 %v994_v13  ;;  %426 = vmatprep.subr.bf16.mxu1 %v996_v14  ;;  %v71_v35 = vpack.c.bf16 %v70_v34, %v69_v33  ;;  %v1025_v37 = vld [vmem:[#allocation8 + $0xc0] sm:$0xff]   ;;  %v1028_v40 = vld [vmem:[#allocation8 + $0x48] sm:$0xff]   ;;  %v1032_v44 = vld [vmem:[#allocation8 + $0x50] sm:$0xff]   ;;  %s839_s11 = sshll.u32 %s1176_s10, 4  ;;  %s840_s11 = int_to_ptr.vmem [resolvable:$true] %s839_s11 }
  0x45   :  { %v1026_v38 = vld [vmem:[#allocation8] sm:$0xff]   ;;  %v1029_v41 = vld [vmem:[#allocation8 + $0xc8] sm:$0xff]   ;;  %v1033_v45 = vld [vmem:[#allocation8 + $0xd0] sm:$0xff]   ;;  %v1249_v8 = vsub.s32 0, %v182_v5  ;;  %v191_v9 = vsub.s32 4, %v182_v5  ;;  %v187_v10 = vsub.s32 2, %v182_v5  ;;  %p1143_p11 = scmp.lt.s32.totalorder %s840_s11, %s840_s11 }
  0x46   :  { %v1027_v39 = vld [vmem:[#allocation8 + $0x80] sm:$0xff]   ;;  %v1030_v42 = vld [vmem:[#allocation8 + $0x8] sm:$0xff]   ;;  %v1034_v46 = vld [vmem:[#allocation8 + $0x10] sm:$0xff]   ;;  %v195_v11 = vsub.s32 6, %v182_v5 }
  0x47   :  { %384 = vmatpush1.bf16.msra.mxu0 %v998_v15  ;;  %427 = vmatpush1.bf16.msra.mxu1 %v999_v16  ;;  %v1031_v43 = vld [vmem:[#allocation8 + $0x88] sm:$0xff]   ;;  %v1035_v47 = vld [vmem:[#allocation8 + $0x90] sm:$0xff]   ;;  %v1036_v48 = vld [vmem:[#allocation8 + $0x58] sm:$0xff]  }
  0x48   :  { %385 = vmatprep.subr.bf16.mxu0 %v1000_v17  ;;  %428 = vmatprep.subr.bf16.mxu1 %v1002_v18  ;;  %v1037_v49 = vld [vmem:[#allocation8 + $0xd8] sm:$0xff]   ;;  %v1040_v52 = vld [vmem:[#allocation8 + $0x60] sm:$0xff]   ;;  %v1044_v56 = vld [vmem:[#allocation8 + $0x68] sm:$0xff]  }
  0x49   :  { %v1038_v50 = vld [vmem:[#allocation8 + $0x18] sm:$0xff]   ;;  %v1041_v53 = vld [vmem:[#allocation8 + $0xe0] sm:$0xff]   ;;  %v1045_v57 = vld [vmem:[#allocation8 + $0xe8] sm:$0xff]  }
  0x4a   :  { %v1039_v51 = vld [vmem:[#allocation8 + $0x98] sm:$0xff]   ;;  %v1042_v54 = vld [vmem:[#allocation8 + $0x20] sm:$0xff]   ;;  %v1046_v58 = vld [vmem:[#allocation8 + $0x28] sm:$0xff]  }
  0x4b   :  { %386 = vmatpush1.bf16.msra.mxu0 %v1004_v19  ;;  %429 = vmatpush1.bf16.msra.mxu1 %v1005_v20  ;;  %v1043_v55 = vld [vmem:[#allocation8 + $0xa0] sm:$0xff]   ;;  %v1047_v59 = vld [vmem:[#allocation8 + $0xa8] sm:$0xff]   ;;  %v1048_v60 = vld [vmem:[#allocation8 + $0x70] sm:$0xff]  }
  0x4c   :  { %387 = vmatprep.subr.bf16.mxu0 %v1006_v21  ;;  %430 = vmatprep.subr.bf16.mxu1 %v1008_v22  ;;  %v1049_v61 = vld [vmem:[#allocation8 + $0xf0] sm:$0xff]   ;;  %v1052_v0 = vld [vmem:[#allocation8 + $0x78] sm:$0xff]  }
  0x4d   :  { %v1050_v62 = vld [vmem:[#allocation8 + $0x30] sm:$0xff]   ;;  %v1053_v1 = vld [vmem:[#allocation8 + $0xf8] sm:$0xff]  }
  0x4e   :  { %v1051_v63 = vld [vmem:[#allocation8 + $0xb0] sm:$0xff]   ;;  %v1054_v2 = vld [vmem:[#allocation8 + $0x38] sm:$0xff]  }
  0x4f   :  { %388 = vmatpush1.bf16.msra.mxu0 %v1010_v23  ;;  %431 = vmatpush1.bf16.msra.mxu1 %v1011_v24  ;;  %v1055_v3 = vld [vmem:[#allocation8 + $0xb8] sm:$0xff]   ;;  %v110_v6 = vld [vmem:[%s1307_s2] sm:$0xf] }
  0x50   :  { %389 = vmatprep.subr.bf16.mxu0 %v1012_v25  ;;  %432 = vmatprep.subr.bf16.mxu1 %v1014_v26  ;;  %v179_v7 = vunpack.c.l.bf16 %v110_v6 }
  0x52   :  { %v184_v12 = vrot.slane %v179_v7, %v1249_v8  ;;  %v192_v13 = vrot.slane %v179_v7, %v191_v9  ;;  %v188_v14 = vrot.slane %v179_v7, %v187_v10  ;;  %v196_v15 = vrot.slane %v179_v7, %v195_v11 }
  0x53   :  { %390 = vmatpush1.bf16.msra.mxu0 %v1016_v27  ;;  %433 = vmatpush1.bf16.msra.mxu1 %v1017_v28 }
  0x54   :  { %391 = vmatprep.subr.bf16.mxu0 %v1018_v29  ;;  %434 = vmatprep.subr.bf16.mxu1 %v1020_v30  ;;  %v204_v16 = vrot.slane %v184_v12, %v1249_v8  ;;  %v212_v17 = vrot.slane %v192_v13, %v1249_v8  ;;  %v208_v18 = vrot.slane %v188_v14, %v1249_v8 }
  0x55   :  { %v216_v19 = vrot.slane %v196_v15, %v1249_v8 }
  0x57   :  { %392 = vmatpush1.bf16.msra.mxu0 %v1022_v31  ;;  %435 = vmatpush1.bf16.msra.mxu1 %v1023_v32 }
  0x58   :  { %921 = vmatprep.subr.bf16.mxu0 %v1024_v36  ;;  %943 = vmatprep.subr.bf16.mxu1 %v1025_v37 }
  0x5a   :  { %410 = vmatmul.mubr.bf16.vlgmr.msra.gmra.mrb[0].mxu0 %v71_v35  ;;  %453 = vmatmul.mubr.bf16.vlgmr.msra.gmra.mrb[0].mxu1 %v71_v35 }
  0x5b   :  { %922 = vmatpush3.bf16.msra.mxu0 %v1026_v38  ;;  %944 = vmatpush3.bf16.msra.mxu1 %v1027_v39 }
  0x5c   :  { %923 = vmatprep.subr.bf16.mxu0 %v1028_v40  ;;  %945 = vmatprep.subr.bf16.mxu1 %v1029_v41 }
  0x5f   :  { %924 = vmatpush3.bf16.msra.mxu0 %v1030_v42  ;;  %946 = vmatpush3.bf16.msra.mxu1 %v1031_v43 }
  0x60   :  { %925 = vmatprep.subr.bf16.mxu0 %v1032_v44  ;;  %947 = vmatprep.subr.bf16.mxu1 %v1033_v45 }
  0x63   :  { %926 = vmatpush3.bf16.msra.mxu0 %v1034_v46  ;;  %948 = vmatpush3.bf16.msra.mxu1 %v1035_v47 }
  0x64   :  { %927 = vmatprep.subr.bf16.mxu0 %v1036_v48  ;;  %949 = vmatprep.subr.bf16.mxu1 %v1037_v49 }
  0x67   :  { %928 = vmatpush3.bf16.msra.mxu0 %v1038_v50  ;;  %950 = vmatpush3.bf16.msra.mxu1 %v1039_v51 }
  0x68   :  { %929 = vmatprep.subr.bf16.mxu0 %v1040_v52  ;;  %951 = vmatprep.subr.bf16.mxu1 %v1041_v53 }
  0x6b   :  { %930 = vmatpush3.bf16.msra.mxu0 %v1042_v54  ;;  %952 = vmatpush3.bf16.msra.mxu1 %v1043_v55 }
  0x6c   :  { %931 = vmatprep.subr.bf16.mxu0 %v1044_v56  ;;  %953 = vmatprep.subr.bf16.mxu1 %v1045_v57 }
  0x6f   :  { %932 = vmatpush3.bf16.msra.mxu0 %v1046_v58  ;;  %954 = vmatpush3.bf16.msra.mxu1 %v1047_v59 }
  0x70   :  { %933 = vmatprep.subr.bf16.mxu0 %v1048_v60  ;;  %955 = vmatprep.subr.bf16.mxu1 %v1049_v61 }
  0x73   :  { %934 = vmatpush3.bf16.msra.mxu0 %v1050_v62  ;;  %956 = vmatpush3.bf16.msra.mxu1 %v1051_v63 }
  0x74   :  { %935 = vmatprep.subr.bf16.mxu0 %v1052_v0  ;;  %957 = vmatprep.subr.bf16.mxu1 %v1053_v1 }
  0x77   :  { %936 = vmatpush3.bf16.msra.mxu0 %v1054_v2  ;;  %958 = vmatpush3.bf16.msra.mxu1 %v1055_v3 }
 0x12d   :  { %v411_v20 = vpop.f32.mrb[0].mxu0  ;;  %v454_v21 = vpop.f32.mrb[0].mxu1 }
 0x12e   :  { %v1256_v22 = vadd.f32 %v411_v20, %v204_v16  ;;  %v1258_v23 = vadd.f32 %v454_v21, %v212_v17  ;;  %v413_v24 = vpop.f32.mrb[1].mxu0  ;;  %v456_v25 = vpop.f32.mrb[1].mxu1 }
 0x12f   :  { %v1260_v26 = vadd.f32 %v413_v24, %v208_v18  ;;  %v1262_v27 = vadd.f32 %v456_v25, %v216_v19  ;;  %v415_v28 = vpop.f32.mrb[2].mxu0  ;;  %v458_v29 = vpop.f32.mrb[2].mxu1 }
 0x130   :  { %v471_v30 = vmul.f32 %v1256_v22, %v1256_v22  ;;  %v473_v31 = vmul.f32 %v1258_v23, %v1258_v23  ;;  %v417_v32 = vpop.f32.mrb[3].mxu0  ;;  %v460_v33 = vpop.f32.mrb[3].mxu1  ;;  %v416_v38 = vadd.f32 %v415_v28, %v204_v16  ;;  %v459_v39 = vadd.f32 %v458_v29, %v212_v17 }
 0x131   :  { %v472_v34 = vmul.f32 %v1260_v26, %v1260_v26  ;;  %v474_v35 = vmul.f32 %v1262_v27, %v1262_v27  ;;  %v1272_v42 = vadd.f32 %v417_v32, %v208_v18  ;;  %v461_v49 = vadd.f32 %v460_v33, %v216_v19 }
 0x132   :  { %v479_v36 = vmul.f32 0.044715, %v471_v30  ;;  %v481_v37 = vmul.f32 0.044715, %v473_v31  ;;  %v475_v45 = vmul.f32 %v416_v38, %v416_v38  ;;  %v477_v48 = vmul.f32 %v459_v39, %v459_v39 }
 0x133   :  { %v480_v40 = vmul.f32 0.044715, %v472_v34  ;;  %v482_v41 = vmul.f32 0.044715, %v474_v35  ;;  %v476_v56 = vmul.f32 %v1272_v42, %v1272_v42  ;;  %v478_v63 = vmul.f32 %v461_v49, %v461_v49 }
 0x134   :  { %v487_v43 = vadd.f32 1.0, %v479_v36  ;;  %v489_v44 = vadd.f32 1.0, %v481_v37  ;;  %v483_v52 = vmul.f32 0.044715, %v475_v45  ;;  %v485_v55 = vmul.f32 0.044715, %v477_v48 }
 0x135   :  { %v488_v46 = vadd.f32 1.0, %v480_v40  ;;  %v490_v47 = vadd.f32 1.0, %v482_v41  ;;  %v484_v1 = vmul.f32 0.044715, %v476_v56  ;;  %v486_v3 = vmul.f32 0.044715, %v478_v63 }
 0x136   :  { %v495_v50 = vmul.f32 %v487_v43, %v1256_v22  ;;  %v497_v51 = vmul.f32 %v489_v44, %v1258_v23  ;;  %v491_v59 = vadd.f32 1.0, %v483_v52  ;;  %v493_v62 = vadd.f32 1.0, %v485_v55 }
 0x137   :  { %v496_v53 = vmul.f32 %v488_v46, %v1260_v26  ;;  %v498_v54 = vmul.f32 %v490_v47, %v1262_v27  ;;  %v492_v5 = vadd.f32 1.0, %v484_v1  ;;  %v494_v7 = vadd.f32 1.0, %v486_v3 }
 0x138   :  { %v503_v57 = vmul.f32 0.7978846, %v495_v50  ;;  %v505_v58 = vmul.f32 0.7978846, %v497_v51  ;;  %v499_v0 = vmul.f32 %v491_v59, %v416_v38  ;;  %v501_v2 = vmul.f32 %v493_v62, %v459_v39 }
 0x139   :  { %v504_v60 = vmul.f32 0.7978846, %v496_v53  ;;  %v506_v61 = vmul.f32 0.7978846, %v498_v54  ;;  %v500_v9 = vmul.f32 %v492_v5, %v1272_v42  ;;  %v502_v10 = vmul.f32 %v494_v7, %v461_v49 }
 0x13a   :  { %1056 = vtanh.f32 %v503_v57  ;;  %v507_v4 = vmul.f32 0.7978846, %v499_v0  ;;  %v509_v6 = vmul.f32 0.7978846, %v501_v2  ;;  %v463_v21 = vmul.f32 0.5, %v1256_v22 }
 0x13b   :  { %1058 = vtanh.f32 %v505_v58  ;;  %v508_v11 = vmul.f32 0.7978846, %v500_v9  ;;  %v510_v12 = vmul.f32 0.7978846, %v502_v10  ;;  %v467_v24 = vmul.f32 0.5, %v416_v38 }
 0x13c   :  { %1060 = vtanh.f32 %v504_v60  ;;  %v465_v28 = vmul.f32 0.5, %v1258_v23  ;;  %v469_v29 = vmul.f32 0.5, %v459_v39  ;;  %v464_v41 = vmul.f32 0.5, %v1260_v26  ;;  %v824_v26 = vld [vmem:[%s1309_s4] sm:$0x1]  ;;  %s1138_s4 = scalar_lea.vmem %s840_s11, 256 }
 0x13d   :  { %1062 = vtanh.f32 %v506_v61  ;;  %v468_v43 = vmul.f32 0.5, %v1272_v42  ;;  %v466_v38 = vmul.f32 0.5, %v1262_v27  ;;  %v470_v45 = vmul.f32 0.5, %v461_v49  ;;  %p1139_p10 = scmp.ne.s32.totalorder %s840_s11, %s1138_s4  ;;  %p1144_p12 = scmp.lt.s32.totalorder %s1138_s4, %s1138_s4 }
 0x13e   :  { %1064 = vtanh.f32 %v507_v4  ;;  %v825_v42 = vunpack.c.l.bf16 %v824_v26 }
 0x13f   :  { %1066 = vtanh.f32 %v509_v6  ;;  %p1145_p13 = por %p1144_p12, %p1143_p11 }
 0x140   :  { %1068 = vtanh.f32 %v508_v11  ;;  %v829_v58 = vrot.slane %v825_v42, %v1249_v8 }
 0x141   :  { %1070 = vtanh.f32 %v510_v12  ;;  %p1146_p0 = pnand %p1145_p13, %p1139_p10 }
 0x144   :  { %v1057_v13 = vpop.eup %1056 }
 0x145   :  { %v1059_v14 = vpop.eup %1058  ;;  %v519_v17 = vadd.f32 1.0, %v1057_v13 }
 0x146   :  { %v1061_v15 = vpop.eup %1060  ;;  %v521_v19 = vadd.f32 1.0, %v1059_v14 }
 0x147   :  { %v1063_v16 = vpop.eup %1062  ;;  %v527_v31 = vmul.f32 %v519_v17, %v463_v21  ;;  %v520_v33 = vadd.f32 1.0, %v1061_v15 }
 0x148   :  { %v1065_v18 = vpop.eup %1064  ;;  %v529_v35 = vmul.f32 %v521_v19, %v465_v28  ;;  %v522_v37 = vadd.f32 1.0, %v1063_v16 }
 0x149   :  { %v1067_v20 = vpop.eup %1066  ;;  %v523_v25 = vadd.f32 1.0, %v1065_v18  ;;  %v528_v46 = vmul.f32 %v520_v33, %v464_v41 }
 0x14a   :  { %v525_v30 = vadd.f32 1.0, %v1067_v20  ;;  %v1069_v34 = vpop.eup %1068  ;;  %v530_v48 = vmul.f32 %v522_v37, %v466_v38 }
 0x14b   :  { %v531_v32 = vmul.f32 %v523_v25, %v467_v24  ;;  %v1071_v40 = vpop.eup %1070  ;;  %v524_v44 = vadd.f32 1.0, %v1069_v34 }
 0x14c   :  { %v533_v36 = vmul.f32 %v525_v30, %v469_v29  ;;  %v526_v23 = vadd.f32 1.0, %v1071_v40 }
 0x14d   :  { %v537_v22 = vpack.c.bf16 %v531_v32, %v527_v31  ;;  %v532_v47 = vmul.f32 %v524_v44, %v468_v43 }
 0x14e   :  { %v539_v39 = vpack.c.bf16 %v533_v36, %v529_v35  ;;  %v534_v50 = vmul.f32 %v526_v23, %v470_v45 }
 0x14f   :  { %v538_v51 = vpack.c.bf16 %v532_v47, %v528_v46 }
 0x150   :  { %v540_v52 = vpack.c.bf16 %v534_v50, %v530_v48 }
 0x151   :  { %765 = vmatprep.mubr.bf16.mxu0 %v538_v51 }
 0x152   :  { %806 = vmatprep.mubr.bf16.mxu1 %v540_v52  ;;  %766 = vmatmul.mubr.bf16.vlgmr.msra.gmra.mrb[4].mxu0 %v537_v22 }
 0x153   :  { %807 = vmatmul.mubr.bf16.vlgmr.msra.gmra.mrb[4].mxu1 %v539_v39 }
 0x225   :  { %v937_v53 = vpop.f32.mrb[4].mxu0 }
 0x226   :  { %v959_v27 = vpop.f32.mrb[4].mxu1  ;;  %v938_v49 = vpop.f32.mrb[5].mxu0 }
 0x227   :  { %v939_v54 = vadd.f32 %v938_v49, %v937_v53  ;;  %v960_v55 = vpop.f32.mrb[5].mxu1  ;;  %v940_v56 = vpop.f32.mrb[6].mxu0 }
 0x228   :  { %v961_v57 = vadd.f32 %v960_v55, %v959_v27  ;;  %v962_v59 = vpop.f32.mrb[6].mxu1  ;;  %v941_v60 = vpop.f32.mrb[7].mxu0 }
 0x229   :  { %v942_v61 = vadd.f32 %v941_v60, %v940_v56  ;;  %v963_v62 = vpop.f32.mrb[7].mxu1 }
 0x22a   :  { %v809_v63 = vadd.f32 %v961_v57, %v939_v54  ;;  %v964_v0 = vadd.f32 %v963_v62, %v962_v59 }
 0x22c   :  { %v830_v1 = vadd.f32 %v829_v58, %v809_v63  ;;  %v812_v2 = vadd.f32 %v964_v0, %v942_v61 }
 0x22e   :  { %832 = vst [vmem:[#allocation9] sm:$0xff] %v830_v1  ;;  %v831_v3 = vadd.f32 %v829_v58, %v812_v2 }
 0x230   :  { %833 = vst [vmem:[#allocation9 + $0x8] sm:$0xff] %v831_v3 }
 0x231   :  { %1149 = shalt.err (!%p1146_p0)
}
 0x232   :  { %s1150_s14 = scalar_lea.hbm %s1310_s5, 256 }
 0x233   :  { %p1151_p1 = scmp.ne.s32.totalorder %s1310_s5, %s1150_s14  ;;  %p1154_p2 = scmp.lt.u32.totalorder %s1150_s14, %s1310_s5 }
 0x235   :  { %p1156_p3 = pnand %p1154_p2, %p1151_p1 }
 0x237   :  { %1159 = shalt.err (!%p1156_p3)
}
 0x238   :  { %845 = dma.vmem_to_hbm [thread:$0]  %s840_s11, 256, %s1310_s5, [#allocation5], %s1170_s1, %s1170_s1, %s1171_s17  }
 0x239   :  { %1164 = dma.done.wait [#allocation5], 256  }
 0x23a   :  { %1165 = vsyncadd [#allocation5], 4294967040 }
 0x23b   :  { %849 = vsyncpa [#allocation4], 1 }
 0x23c   :  { %850 = vsyncpa [#allocation7], 1 }
 0x23d   :  { %851 = vsyncpa [#allocation5], 1 }

</bundles_post_ra>
